<compile_context>
chip_gen: v7x
topology: tpu7x:2x2x1
jax: 0.10.0
libtpu: 0.0.40
codegen_flags: <defaults>
</compile_context>

<pallas_src>
import functools

import jax
import jax.numpy as jnp
from jax.experimental import pallas as pl
from jax.experimental.pallas import tpu as pltpu

EPS = 1e-6

# Rows per block. Sized so double-buffered f32 streams (3 in + 1 out for the
# dropout kernel) stay well under v7x's 64 MiB VMEM even for H ~ 4096, while
# still amortizing the ~0.35 us per-grid-step overhead on v5e/v6e.
_TILE_CAP = 256


def _pick_tile_rows(r, cap=_TILE_CAP):
    """Largest multiple of 8 that divides r (<= cap); else the full extent.

    Guarantees the row block is either a multiple of 8 or equal to the full
    array extent, satisfying the (8, 128) BlockSpec constraint.
    """
    t = min(cap, r)
    t -= t % 8
    while t >= 8:
        if r % t == 0:
            return t
        t -= 8
    return r


def _lane_dense_2d(total, h):
    """Pick a lane-dense 2-D shape for purely elementwise kernels."""
    if h % 128 == 0:
        return (total // h, h)
    if total % 128 == 0:          # fold rows into a dense 128-wide lane axis
        return (total // 128, 128)
    return (total // h, h)


# ---------------------------------------------------------------------------
# Kernel 1: LayerNorm over the last dim (matches the PyTorch module:
# torch.std -> unbiased estimator with N-1 denominator, eps inside the sqrt
# added to std**2, then affine).
# ---------------------------------------------------------------------------
def _layernorm_kernel(x_ref, g_ref, b_ref, o_ref):
    x = x_ref[...].astype(jnp.float32)
    n = x.shape[-1]
    mean = jnp.mean(x, axis=-1, keepdims=True)
    diff = x - mean
    var_unbiased = jnp.sum(diff * diff, axis=-1, keepdims=True) / (n - 1)
    inv = jax.lax.rsqrt(var_unbiased + EPS)
    y = g_ref[...].astype(jnp.float32) * (diff * inv) + b_ref[...].astype(jnp.float32)
    o_ref[...] = y.astype(o_ref.dtype)


def layernorm(x2d, gamma, beta):
    R, H = x2d.shape
    tr = _pick_tile_rows(R)
    row_blk = pl.BlockSpec((tr, H), lambda i: (i, 0))
    vec_blk = pl.BlockSpec((1, H), lambda i: (0, 0))   # gamma/beta stay VMEM-resident
    return pl.pallas_call(
        _layernorm_kernel,
        out_shape=jax.ShapeDtypeStruct((R, H), x2d.dtype),
        grid=(R // tr,),
        in_specs=[row_blk, vec_blk, vec_blk],
        out_specs=row_blk,
        compiler_params=pltpu.CompilerParams(dimension_semantics=("parallel",)),
    )(x2d, gamma.reshape(1, H), beta.reshape(1, H))


# ---------------------------------------------------------------------------
# Kernel 2: residual + inverted dropout (training semantics: drop with prob
# `rate`, scale kept values by 1/(1-rate)). Random bits are a uint32 input
# stream; the mask compare / select / add run on the VPU and hide under DMA.
# ---------------------------------------------------------------------------
def _dropout_residual_kernel(x_ref, y_ref, bits_ref, o_ref, *, rate):
    x = x_ref[...].astype(jnp.float32)
    y = y_ref[...].astype(jnp.float32)
    # Full 32-bit threshold compare (no shift): drop iff bits < rate * 2^32.
    thresh = jnp.uint32(min(int(rate * float(1 << 32)), (1 << 32) - 1))
    keep = bits_ref[...] >= thresh
    y = jnp.where(keep, y * jnp.float32(1.0 / (1.0 - rate)), jnp.float32(0.0))
    o_ref[...] = (x + y).astype(o_ref.dtype)


def _residual_kernel(x_ref, y_ref, o_ref):
    o_ref[...] = (x_ref[...].astype(jnp.float32)
                  + y_ref[...].astype(jnp.float32)).astype(o_ref.dtype)


def dropout_residual(x2d, y2d, rate, key):
    R, H = x2d.shape
    tr = _pick_tile_rows(R)
    blk = pl.BlockSpec((tr, H), lambda i: (i, 0))
    common = dict(
        out_shape=jax.ShapeDtypeStruct((R, H), x2d.dtype),
        grid=(R // tr,),
        out_specs=blk,
        # x2d is dead after this op; alias it to the output to drop one HBM
        # allocation / copy.
        input_output_aliases={0: 0},
        compiler_params=pltpu.CompilerParams(dimension_semantics=("parallel",)),
    )
    if rate > 0.0:
        bits = jax.random.bits(key, (R, H), dtype=jnp.uint32)
        kernel = functools.partial(_dropout_residual_kernel, rate=float(rate))
        return pl.pallas_call(kernel, in_specs=[blk, blk, blk], **common)(
            x2d, y2d, bits)
    return pl.pallas_call(_residual_kernel, in_specs=[blk, blk], **common)(
        x2d, y2d)


# ---------------------------------------------------------------------------
# SublayerConnection.forward(x, sublayer)
# ---------------------------------------------------------------------------
def sublayer_connection(x, sublayer, gamma, beta, *, dropout_rate, key):
    B, S, H = x.shape
    x2d = x.reshape(B * S, H)

    x_norm = layernorm(x2d, gamma, beta).reshape(B, S, H)
    y = sublayer(x_norm)                 # arbitrary sublayer: plain-JAX glue

    # The dropout+residual kernel is purely elementwise, so repack to a
    # lane-dense slab (last dim multiple of 128) when H itself is not.
    total = B * S * H
    pack_shape = _lane_dense_2d(total, H)
    xp = x.reshape(pack_shape)
    yp = y.reshape(pack_shape)
    out = dropout_residual(xp, yp, dropout_rate, key)
    return out.reshape(B, S, H)


if __name__ == "__main__":
    B, S, H = 2, 8, 32
    dropout_rate = 0.1

    key = jax.random.PRNGKey(0)
    kx, kw, kb, kdrop = jax.random.split(key, 4)

    x = jax.random.normal(kx, (B, S, H), dtype=jnp.float32)

    # LayerNorm params (init as in the module: ones / zeros).
    gamma = jnp.ones((H,), dtype=jnp.float32)
    beta = jnp.zeros((H,), dtype=jnp.float32)

    # Example sublayer: a small deterministic Linear + ReLU (stands in for the
    # attention / feed-forward block that SublayerConnection wraps).
    W = jax.random.normal(kw, (H, H), dtype=jnp.float32) * 0.02
    bvec = jax.random.normal(kb, (H,), dtype=jnp.float32) * 0.02
    sublayer = lambda t: jax.nn.relu(t @ W + bvec)

    out = sublayer_connection(
        x, sublayer, gamma, beta, dropout_rate=dropout_rate, key=kdrop
    )
    out = jax.block_until_ready(out)

    assert out.shape == (B, S, H)
    assert bool(jnp.all(jnp.isfinite(out)))
    print("KERNEL_OK")
</pallas_src>

<mosaic_0001>
module attributes {stable_mosaic.version = 11 : i64} {
  func.func @_layernorm_kernel(%arg0: i32, %arg1: memref<16x32xf32, #tpu.memory_space<vmem>>, %arg2: memref<1x32xf32, #tpu.memory_space<vmem>>, %arg3: memref<1x32xf32, #tpu.memory_space<vmem>>, %arg4: memref<16x32xf32, #tpu.memory_space<vmem>>) attributes {dimension_semantics = [#tpu.dimension_semantics<parallel>], iteration_bounds = array<i64: 1>, scalar_prefetch = 0 : i64, scratch_operands = 0 : i64, tpu.core_type = #tpu.core_type<tc>, window_params = [{transform_indices = @transform_0, window_bounds = array<i64: 16, 32>}, {pipeline_mode = #tpu.pipeline_mode<synchronous>, transform_indices = @transform_1, window_bounds = array<i64: 1, 32>}, {pipeline_mode = #tpu.pipeline_mode<synchronous>, transform_indices = @transform_2, window_bounds = array<i64: 1, 32>}, {transform_indices = @transform_3, window_bounds = array<i64: 16, 32>}]} {
    %c0 = arith.constant 0 : index
    %c0_0 = arith.constant 0 : index
    %0 = vector.load %arg1[%c0, %c0_0] : memref<16x32xf32, #tpu.memory_space<vmem>>, vector<16x32xf32>
    %cst = arith.constant dense<0.000000e+00> : vector<16xf32>
    %1 = vector.multi_reduction <add>, %0, %cst [1] : vector<16x32xf32> to vector<16xf32>
    %2 = vector.shape_cast %1 : vector<16xf32> to vector<16x1xf32>
    %cst_1 = arith.constant 3.200000e+01 : f32
    %3 = vector.broadcast %cst_1 : f32 to vector<16x1xf32>
    %4 = arith.divf %2, %3 : vector<16x1xf32>
    %5 = vector.broadcast %4 : vector<16x1xf32> to vector<16x32xf32>
    %6 = arith.subf %0, %5 : vector<16x32xf32>
    %7 = arith.mulf %6, %6 : vector<16x32xf32>
    %cst_2 = arith.constant dense<0.000000e+00> : vector<16xf32>
    %8 = vector.multi_reduction <add>, %7, %cst_2 [1] : vector<16x32xf32> to vector<16xf32>
    %9 = vector.shape_cast %8 : vector<16xf32> to vector<16x1xf32>
    %cst_3 = arith.constant 3.100000e+01 : f32
    %10 = vector.broadcast %cst_3 : f32 to vector<16x1xf32>
    %11 = arith.divf %9, %10 : vector<16x1xf32>
    %cst_4 = arith.constant 9.99999997E-7 : f32
    %12 = vector.broadcast %cst_4 : f32 to vector<16x1xf32>
    %13 = arith.addf %11, %12 : vector<16x1xf32>
    %14 = math.rsqrt %13 : vector<16x1xf32>
    %c0_5 = arith.constant 0 : index
    %c0_6 = arith.constant 0 : index
    %15 = vector.load %arg2[%c0_5, %c0_6] : memref<1x32xf32, #tpu.memory_space<vmem>>, vector<1x32xf32>
    %16 = vector.broadcast %14 : vector<16x1xf32> to vector<16x32xf32>
    %17 = arith.mulf %6, %16 : vector<16x32xf32>
    %18 = vector.broadcast %15 : vector<1x32xf32> to vector<16x32xf32>
    %19 = arith.mulf %18, %17 : vector<16x32xf32>
    %c0_7 = arith.constant 0 : index
    %c0_8 = arith.constant 0 : index
    %20 = vector.load %arg3[%c0_7, %c0_8] : memref<1x32xf32, #tpu.memory_space<vmem>>, vector<1x32xf32>
    %21 = vector.broadcast %20 : vector<1x32xf32> to vector<16x32xf32>
    %22 = arith.addf %19, %21 : vector<16x32xf32>
    %c0_9 = arith.constant 0 : index
    %c0_10 = arith.constant 0 : index
    %23 = vector.load %arg4[%c0_9, %c0_10] : memref<16x32xf32, #tpu.memory_space<vmem>>, vector<16x32xf32>
    tpu.vector_store %arg4[%c0_9, %c0_10], %22 {strides = array<i32>} : memref<16x32xf32, #tpu.memory_space<vmem>>, vector<16x32xf32>,
    return
  }
  func.func @transform_0(%arg0: i32) -> (i32, i32) {
    %c0_i32 = arith.constant 0 : i32
    %c0_i32_0 = arith.constant 0 : i32
    return %arg0, %c0_i32 : i32, i32
  }
  func.func @transform_1(%arg0: i32) -> (i32, i32) {
    %c0_i32 = arith.constant 0 : i32
    %c0_i32_0 = arith.constant 0 : i32
    %c0_i32_1 = arith.constant 0 : i32
    return %c0_i32, %c0_i32_0 : i32, i32
  }
  func.func @transform_2(%arg0: i32) -> (i32, i32) {
    %c0_i32 = arith.constant 0 : i32
    %c0_i32_0 = arith.constant 0 : i32
    %c0_i32_1 = arith.constant 0 : i32
    return %c0_i32, %c0_i32_0 : i32, i32
  }
  func.func @transform_3(%arg0: i32) -> (i32, i32) {
    %c0_i32 = arith.constant 0 : i32
    %c0_i32_0 = arith.constant 0 : i32
    return %arg0, %c0_i32 : i32, i32
  }
}

</mosaic_0001>

<bundles_post_ra>
// kernel: tpu_custom_call.1
= control target key start
LH: loop header
LB: loop body
LE: loop exit
PB: predicated region body
PF: predicated region fallthrough
CT: control target
= control target key end

     0   :  { %8 = vsyncpa [#allocation3], 0  ;;  %s221_s0 = inlined_call_operand.hbm [shape: f32[16,32], index: 0, kind: input, shape index: {}]   ;;  %s222_s1 = inlined_call_operand.vmem [shape: f32[1,32], index: 1, kind: input, shape index: {}]   ;;  %s223_s2 = inlined_call_operand.vmem [shape: f32[1,32], index: 2, kind: input, shape index: {}]   ;;  %s224_s3 = inlined_call_operand.hbm [shape: f32[16,32], index: 3, kind: output, shape index: {}]  }
   0x1   :  { %9 = vsyncpa [#allocation4], 0  ;;  %s155_s12 = smov [#allocation2]   ;;  %s107_s16 = scalar_lea.hbm %s221_s0, 256 }
   0x2   :  { %s15_s13 = sshll.u32 %s155_s12, 4  ;;  %p108_p0 = scmp.ne.s32.totalorder %s221_s0, %s107_s16  ;;  %s16_s13 = int_to_ptr.vmem [resolvable:$true] %s15_s13 }
   0x3   :  { %p111_p1 = scmp.lt.u32.totalorder %s107_s16, %s221_s0 }
   0x5   :  { %p113_p2 = pnand %p111_p1, %p108_p0 }
   0x7   :  { %116 = shalt.err (!%p113_p2)
}
   0x8   :  { %s117_s21 = scalar_lea.vmem %s16_s13, 256  ;;  %p122_p4 = scmp.lt.s32.totalorder %s16_s13, %s16_s13 }
   0x9   :  { %p118_p3 = scmp.ne.s32.totalorder %s16_s13, %s117_s21  ;;  %p123_p5 = scmp.lt.s32.totalorder %s117_s21, %s117_s21 }
   0xb   :  { %p124_p6 = por %p123_p5, %p122_p4 }
   0xd   :  { %p125_p7 = pnand %p124_p6, %p118_p3 }
   0xf   :  { %128 = shalt.err (!%p125_p7)
}
  0x10   :  { %s156_s22 = smov 128   ;;  %s157_s23 = smov 8  }
  0x11   :  { %21 = dma.hbm_to_vmem [thread:$0]  %s221_s0, 256, %s16_s13, [#allocation3], %s156_s22, %s156_s22, %s157_s23  }
  0x12   :  { %151 = dma.done.wait [#allocation3], 256  }
  0x13   :  { %152 = vsyncadd [#allocation3], 4294967040  ;;  %vm31_vm0 = vcmask 261120   ;;  %v29_v0 = vld [vmem:[#allocation2] sm:$0xff]  ;;  %v30_v1 = vld [vmem:[#allocation2 + $0x8] sm:$0xff]  ;;  %s158_s29 = smov [#allocation5]  }
  0x14   :  { %v32_v2 = vsel %vm31_vm0, %v29_v0, 0.0  ;;  %v35_v3 = vsel %vm31_vm0, %v30_v1, 0.0  ;;  %v97_v21 = vld [vmem:[%s222_s1] ss:$0 sm:$0xff]  ;;  %s85_s30 = sshll.u32 %s158_s29, 4  ;;  %s86_s30 = int_to_ptr.vmem [resolvable:$true] %s85_s30 }
  0x15   :  { %33 = vadd.xlane.f32.xlu0 %v32_v2  ;;  %v98_v23 = vld [vmem:[%s223_s2] ss:$0 sm:$0xff]  ;;  %s129_s4 = scalar_lea.vmem %s86_s30, 256  ;;  %p134_p9 = scmp.lt.s32.totalorder %s86_s30, %s86_s30 }
  0x16   :  { %p130_p8 = scmp.ne.s32.totalorder %s86_s30, %s129_s4  ;;  %p135_p10 = scmp.lt.s32.totalorder %s129_s4, %s129_s4 }
  0x18   :  { %p136_p11 = por %p135_p10, %p134_p9 }
  0x19   :  { %36 = vadd.xlane.f32.xlu0 %v35_v3 }
  0x1a   :  { %p137_p12 = pnand %p136_p11, %p130_p8 }
  0xa2   :  { %v34_v4 = vpop.xlane.xlu0 %33 }
  0xa3   :  { %v39_v5 = vmul.f32 0.03125, %v34_v4 }
  0xa5   :  { %v41_v6 = vsub.f32 %v29_v0, %v39_v5 }
  0xa6   :  { %v37_v7 = vpop.xlane.xlu0 %36 }
  0xa7   :  { %v40_v8 = vmul.f32 0.03125, %v37_v7  ;;  %v43_v9 = vmul.f32 %v41_v6, %v41_v6 }
  0xa9   :  { %v42_v10 = vsub.f32 %v30_v1, %v40_v8  ;;  %v45_v11 = vsel %vm31_vm0, %v43_v9, 0.0 }
  0xaa   :  { %46 = vadd.xlane.f32.xlu1 %v45_v11 }
  0xab   :  { %v44_v12 = vmul.f32 %v42_v10, %v42_v10 }
  0xad   :  { %v48_v13 = vsel %vm31_vm0, %v44_v12, 0.0 }
  0xae   :  { %49 = vadd.xlane.f32.xlu1 %v48_v13 }
 0x137   :  { %v47_v14 = vpop.xlane.xlu1 %46 }
 0x138   :  { %v52_v15 = vmul.f32 0.032258064, %v47_v14 }
 0x13a   :  { %v54_v16 = vadd.f32 1e-06, %v52_v15 }
 0x13b   :  { %v50_v17 = vpop.xlane.xlu1 %49 }
 0x13c   :  { %103 = vrsqrt.f32 %v54_v16  ;;  %v53_v18 = vmul.f32 0.032258064, %v50_v17 }
 0x13e   :  { %v55_v19 = vadd.f32 1e-06, %v53_v18 }
 0x140   :  { %105 = vrsqrt.f32 %v55_v19 }
 0x146   :  { %v104_v20 = vpop.eup %103 }
 0x147   :  { %v59_v22 = vmul.f32 %v104_v20, %v41_v6 }
 0x149   :  { %v67_v24 = vmul.f32 %v97_v21, %v59_v22 }
 0x14a   :  { %v106_v25 = vpop.eup %105 }
 0x14b   :  { %v60_v26 = vmul.f32 %v106_v25, %v42_v10  ;;  %v76_v27 = vadd.f32 %v98_v23, %v67_v24 }
 0x14d   :  { %v68_v28 = vmul.f32 %v97_v21, %v60_v26  ;;  %78 = vst.msk [vmem:[#allocation5] sm:$0xff] %vm31_vm0, %v76_v27 }
 0x14f   :  { %v77_v29 = vadd.f32 %v98_v23, %v68_v28 }
 0x151   :  { %79 = vst.msk [vmem:[#allocation5 + $0x8] sm:$0xff] %vm31_vm0, %v77_v29 }
 0x152   :  { %140 = shalt.err (!%p137_p12)
}
 0x153   :  { %s141_s5 = scalar_lea.hbm %s224_s3, 256 }
 0x154   :  { %p142_p13 = scmp.ne.s32.totalorder %s224_s3, %s141_s5  ;;  %p145_p0 = scmp.lt.u32.totalorder %s141_s5, %s224_s3 }
 0x156   :  { %p147_p1 = pnand %p145_p0, %p142_p13 }
 0x158   :  { %150 = shalt.err (!%p147_p1)
}
 0x159   :  { %91 = dma.vmem_to_hbm [thread:$0]  %s86_s30, 256, %s224_s3, [#allocation4], %s156_s22, %s156_s22, %s157_s23  }
 0x15a   :  { %153 = dma.done.wait [#allocation4], 256  }
 0x15b   :  { %154 = vsyncadd [#allocation4], 4294967040 }
 0x15c   :  { %95 = vsyncpa [#allocation3], 1 }
 0x15d   :  { %96 = vsyncpa [#allocation4], 1 }

</bundles_post_ra>
